<compile_context>
chip_gen: v7x
topology: tpu7x:2x2x1
jax: 0.10.0
libtpu: 0.0.40
codegen_flags: <defaults>
</compile_context>

<pallas_src>
import jax
import jax.numpy as jnp
from jax.experimental import pallas as pl
from jax.experimental.pallas import tpu as pltpu


def _round_up(x, m):
    return (x + m - 1) // m * m


def _patch_embed_kernel(patch_ref, w_ref, pos_ref, o_ref):
    # patch_ref: (tp, K)      bf16 -- patch rows of one batch element
    # w_ref:     (K, H_pad)   bf16 -- reshaped conv weight (VMEM-resident)
    # pos_ref:   (tp, H_pad)  f32  -- position embeddings + conv bias (resident)
    # o_ref:     (tp, H_pad)       -- output tile (full hidden width, lane-dense)
    acc = jnp.dot(patch_ref[...], w_ref[...], preferred_element_type=jnp.float32)
    o_ref[...] = (acc + pos_ref[...]).astype(o_ref.dtype)


def embeddings_forward(x, conv_w, conv_b, pos_emb, patch_size, out_dtype=None):
    """x: (B, C, H, W) float32. conv_w: (hidden, C, ph, pw). conv_b: (hidden,).
    pos_emb: (1, n_patches, hidden). Returns (embeddings (B, P, hidden), features=None)."""
    B, C, H, W = x.shape
    ph, pw = patch_size
    hidden = conv_w.shape[0]
    gh, gw = H // ph, W // pw
    P = gh * gw
    K = C * ph * pw
    out_dtype = x.dtype if out_dtype is None else out_dtype
    out_bytes = jnp.dtype(out_dtype).itemsize

    # --- host/glue: patchify as a single cast+transpose (fuses to one XLA copy
    # under jit).  k-index ordering (C, ph, pw) matches the conv weight layout.
    patches = x.astype(jnp.bfloat16).reshape(B, C, gh, ph, gw, pw)
    patches = patches.transpose(0, 2, 4, 1, 3, 5).reshape(B, P, K)   # (B, P, K)

    w2d = conv_w.reshape(hidden, K).T.astype(jnp.bfloat16)           # (K, hidden)
    # Fold the conv bias into the (resident) position table; f32 epilogue.
    pos_bias = (pos_emb.reshape(P, hidden) + conv_b[None, :]).astype(jnp.float32)

    # --- pad hidden to a lane multiple (weight/pos only — tiny, no activation pad).
    H_pad = _round_up(hidden, 128)
    if H_pad != hidden:
        w2d = jnp.pad(w2d, ((0, 0), (0, H_pad - hidden)))
        pos_bias = jnp.pad(pos_bias, ((0, 0), (0, H_pad - hidden)))

    # --- P tile: full P per batch element when it fits VMEM (pos resident,
    # no P padding); otherwise tile P in multiples of 8 (edge block masked).
    def vmem_est(tp):
        return (2 * tp * K * 2              # patches block (double-buffered)
                + 2 * K * H_pad * 2          # resident weight buffers
                + 2 * tp * H_pad * 4         # pos block
                + 2 * tp * H_pad * out_bytes)  # output block

    tp = P if P <= 512 else 512
    while vmem_est(tp) > 36 * 1024 * 1024 and tp > 16:
        tp = max(16, ((tp // 2) + 7) // 8 * 8)
    Pt = pl.cdiv(P, tp)

    vmem_limit = int(min(64 * 1024 * 1024,
                         max(16 * 1024 * 1024, vmem_est(tp) * 3 // 2)))

    out = pl.pallas_call(
        _patch_embed_kernel,
        out_shape=jax.ShapeDtypeStruct((B, P, H_pad), out_dtype),
        grid_spec=pltpu.PrefetchScalarGridSpec(
            num_scalar_prefetch=0,
            grid=(B, Pt),
            in_specs=[
                # patch rows of one batch element
                pl.BlockSpec((None, tp, K), lambda b, p: (b, p, 0)),
                # weight: constant block index -> fetched into VMEM exactly once
                pl.BlockSpec((K, H_pad), lambda b, p: (0, 0)),
                # pos(+bias): batch-independent; constant (resident) when Pt == 1
                pl.BlockSpec((tp, H_pad), lambda b, p: (p, 0)),
            ],
            out_specs=pl.BlockSpec((None, tp, H_pad), lambda b, p: (b, p, 0)),
        ),
        compiler_params=pltpu.CompilerParams(
            dimension_semantics=("parallel", "parallel"),
            vmem_limit_bytes=vmem_limit),
        cost_estimate=pl.CostEstimate(
            flops=2 * B * P * K * H_pad,
            transcendentals=0,
            bytes_accessed=(B * P * K * 2 + K * H_pad * 2
                            + P * H_pad * 4 + B * P * H_pad * out_bytes)),
    )(patches, w2d, pos_bias)

    if H_pad != hidden:
        out = out[:, :, :hidden]   # no-op for standard ViT hidden sizes
    features = None  # non-hybrid path
    return out, features


if __name__ == "__main__":
    # Small config consistent with the module: img=16, patch=4 -> n_patches=16,
    # in_channels=3, hidden_size=32, batch=2.
    B, C, H, W = 2, 3, 16, 16
    ph, pw = 4, 4
    hidden = 32
    n_patches = (H // ph) * (W // pw)

    key = jax.random.PRNGKey(0)
    kx, kw, kb = jax.random.split(key, 3)

    x = jax.random.normal(kx, (B, C, H, W), dtype=jnp.float32)

    # Deterministic parameter init (Conv2d weight/bias random; position
    # embeddings are zeros, matching nn.Parameter(torch.zeros(...))).
    fan_in = C * ph * pw
    bound = 1.0 / (fan_in ** 0.5)
    conv_w = jax.random.uniform(kw, (hidden, C, ph, pw),
                                minval=-bound, maxval=bound, dtype=jnp.float32)
    conv_b = jax.random.uniform(kb, (hidden,),
                                minval=-bound, maxval=bound, dtype=jnp.float32)
    pos_emb = jnp.zeros((1, n_patches, hidden), dtype=jnp.float32)

    emb, feats = embeddings_forward(x, conv_w, conv_b, pos_emb, (ph, pw))
    emb = jax.block_until_ready(emb)

    # Pure-JAX f32 reference (patchify-as-matmul == stride-ph/pw Conv2d).
    # Kernel uses bf16 MXU operands with f32 accumulation -> bf16-level tolerance.
    p = x.reshape(B, C, H // ph, ph, W // pw, pw).transpose(0, 2, 4, 1, 3, 5)
    p = p.reshape(B, n_patches, C * ph * pw)
    ref = jnp.einsum("bpk,hk->bph", p, conv_w.reshape(hidden, -1)) + conv_b + pos_emb
    assert emb.shape == (B, n_patches, hidden)
    assert feats is None
    assert jnp.allclose(emb, ref, atol=5e-2, rtol=5e-2)

    print("KERNEL_OK")
</pallas_src>

<mosaic_0001>
module attributes {stable_mosaic.version = 11 : i64} {
  func.func @_patch_embed_kernel(%arg0: i32, %arg1: i32, %arg2: memref<1x16x48xbf16, #tpu.memory_space<vmem>>, %arg3: memref<48x128xbf16, #tpu.memory_space<vmem>>, %arg4: memref<16x128xf32, #tpu.memory_space<vmem>>, %arg5: memref<1x16x128xf32, #tpu.memory_space<vmem>>) attributes {dimension_semantics = [#tpu.dimension_semantics<parallel>, #tpu.dimension_semantics<parallel>], iteration_bounds = array<i64: 2, 1>, scalar_prefetch = 0 : i64, scratch_operands = 0 : i64, tpu.core_type = #tpu.core_type<tc>, window_params = [{transform_indices = @transform_0, window_bounds = array<i64: 1, 16, 48>}, {pipeline_mode = #tpu.pipeline_mode<synchronous>, transform_indices = @transform_1, window_bounds = array<i64: 48, 128>}, {transform_indices = @transform_2, window_bounds = array<i64: 16, 128>}, {transform_indices = @transform_3, window_bounds = array<i64: 1, 16, 128>}]} {
    %c0 = arith.constant 0 : index
    %c0_0 = arith.constant 0 : index
    %c0_1 = arith.constant 0 : index
    %0 = vector.load %arg2[%c0, %c0_0, %c0_1] : memref<1x16x48xbf16, #tpu.memory_space<vmem>>, vector<1x16x48xbf16>
    %1 = vector.shape_cast %0 : vector<1x16x48xbf16> to vector<16x48xbf16>
    %c0_2 = arith.constant 0 : index
    %c0_3 = arith.constant 0 : index
    %2 = vector.load %arg3[%c0_2, %c0_3] : memref<48x128xbf16, #tpu.memory_space<vmem>>, vector<48x128xbf16>
    %cst = arith.constant dense<0.000000e+00> : vector<16x128xf32>
    %3 = tpu.matmul %1, %2, %cst {dimension_numbers = #tpu.dot_dimension_numbers<[1], [0], [0], [1], [0, 0, 1, 1], [], []>} : vector<16x48xbf16>, vector<48x128xbf16>, vector<16x128xf32> -> vector<16x128xf32>
    %c0_4 = arith.constant 0 : index
    %c0_5 = arith.constant 0 : index
    %4 = vector.load %arg4[%c0_4, %c0_5] : memref<16x128xf32, #tpu.memory_space<vmem>>, vector<16x128xf32>
    %5 = arith.addf %3, %4 : vector<16x128xf32>
    %c0_6 = arith.constant 0 : index
    %c0_7 = arith.constant 0 : index
    %c0_8 = arith.constant 0 : index
    %6 = vector.load %arg5[%c0_6, %c0_7, %c0_8] : memref<1x16x128xf32, #tpu.memory_space<vmem>>, vector<1x16x128xf32>
    %7 = vector.shape_cast %6 : vector<1x16x128xf32> to vector<16x128xf32>
    %8 = vector.shape_cast %5 : vector<16x128xf32> to vector<1x16x128xf32>
    tpu.vector_store %arg5[%c0_6, %c0_7, %c0_8], %8 {strides = array<i32>} : memref<1x16x128xf32, #tpu.memory_space<vmem>>, vector<1x16x128xf32>,
    return
  }
  func.func @transform_0(%arg0: i32, %arg1: i32) -> (i32, i32, i32) {
    %c0_i32 = arith.constant 0 : i32
    %c0_i32_0 = arith.constant 0 : i32
    return %arg0, %arg1, %c0_i32 : i32, i32, i32
  }
  func.func @transform_1(%arg0: i32, %arg1: i32) -> (i32, i32) {
    %c0_i32 = arith.constant 0 : i32
    %c0_i32_0 = arith.constant 0 : i32
    %c0_i32_1 = arith.constant 0 : i32
    return %c0_i32, %c0_i32_0 : i32, i32
  }
  func.func @transform_2(%arg0: i32, %arg1: i32) -> (i32, i32) {
    %c0_i32 = arith.constant 0 : i32
    %c0_i32_0 = arith.constant 0 : i32
    return %arg1, %c0_i32 : i32, i32
  }
  func.func @transform_3(%arg0: i32, %arg1: i32) -> (i32, i32, i32) {
    %c0_i32 = arith.constant 0 : i32
    %c0_i32_0 = arith.constant 0 : i32
    return %arg0, %arg1, %c0_i32 : i32, i32, i32
  }
}

</mosaic_0001>

<bundles_post_ra>
// kernel: tpu_custom_call.1
= control target key start
LH: loop header
LB: loop body
LE: loop exit
PB: predicated region body
PF: predicated region fallthrough
CT: control target
= control target key end

     0   :  { %8 = vsyncpa [#allocation3], 0  ;;  %s1055_s0 = inlined_call_operand.hbm [shape: bf16[2,16,48], index: 0, kind: input, shape index: {}]   ;;  %s1056_s1 = inlined_call_operand.hbm [shape: bf16[48,128], index: 1, kind: input, shape index: {}]   ;;  %s1057_s2 = inlined_call_operand.hbm [shape: f32[16,128], index: 2, kind: input, shape index: {}]   ;;  %s1058_s3 = inlined_call_operand.hbm [shape: f32[2,16,128], index: 3, kind: output, shape index: {}]  }
   0x1   :  { %10 = vsyncpa [#allocation3 + $0x1], 0 }
   0x2   :  { %11 = vsyncpa [#allocation6], 0 }
   0x3   :  { %12 = vsyncpa [#allocation4], 0 }
   0x4   :  { %14 = vsyncpa [#allocation4 + $0x1], 0  ;;  %s793_s12 = smov 0   ;;  %s795_s13 = smov 0  }
   0x5   :  { %s797_s14 = smov 0   ;;  %s799_s15 = smov 0  }
   0x6   :  { %s801_s16 = smov 0   ;;  %s803_s17 = smov 0  }
   0x7 LB: > { %s452_s18 = sadd.s32 4294967295, %s759_s17   ;;  %s453_s19 = sadd.s32 4294967294, %s759_s17   ;;  %s759_s17 = sphi %s803_s17, %s20_s17   ;;  %s755_s16 = sphi %s801_s16, %s1080_s16   ;;  %s751_s15 = sphi %s799_s15, %s1079_s15   ;;  %s747_s14 = sphi %s797_s14, %s1078_s14   ;;  %s743_s13 = sphi %s795_s13, %s1077_s13   ;;  %s739_s12 = sphi %s793_s12, %s1076_s12  }
   0x8   : > { %p54_p0 = scmp.ne.s32.totalorder %s743_s13, %s739_s12  ;;  %p827_p1 = scmp.eq.s32.totalorder %s452_s18, 0 }
   0x9   : > { %p831_p2 = scmp.eq.s32.totalorder %s452_s18, 1  ;;  %p133_p3 = scmp.eq.s32.totalorder %s453_s19, 1 }
   0xa   : > { %s1063_s20 = scalar_select %p827_p1, 1, 0 }
   0xb   : > { %p837_p4 = por %p827_p1, %p54_p0  ;;  %p454_p5 = scmp.ge.s32.totalorder %s759_s17, 1 }
   0xc   : > { %p842_p6 = por %p133_p3, %p54_p0  ;;  %p140_p7 = scmp.lt.s32.totalorder %s759_s17, 3 }
   0xd   : > { %s1065_s22 = scalar_select %p837_p4, 1, 0 }
   0xe   : > { %s1066_s23 = scalar_select %p842_p6, 1, 0 }
   0xf   : > { %p847_p8 = pnand %p454_p5, %p140_p7  ;;  %s761_s25 = smov [#allocation5]  }
  0x10   : > { %s152_s26 = sshll.u32 %s761_s25, 4  ;;  %s762_s28 = smov [#allocation7]   ;;  %s851_s26 = int_to_ptr.vmem [resolvable:$true] %s152_s26 }
  0x11   : > { %p504_p9 = pneg %p847_p8  ;;  %s168_s29 = sshll.u32 %s762_s28, 4  ;;  %s862_s29 = int_to_ptr.vmem [resolvable:$true] %s168_s29 }
  0x12   : > { %s587_s5 = scalar_lea.hbm %s1056_s1, 384 }
  0x13   : > { %p858_p11 = pnand %p504_p9, %p827_p1  ;;  %p588_p12 = scmp.ne.s32.totalorder %s1056_s1, %s587_s5 }
  0x14   : > { %p594_p5 = scmp.lt.u32.totalorder %s587_s5, %s1056_s1 }
  0x15   : > { %p589_p13 = pneg %p858_p11 }
  0x17   : > { %p590_p0 = pnand %p589_p13, %p588_p12 }
  0x19   : > { %p591_p3 = pneg %p590_p0 }
  0x1b   : > { %p596_p7 = pnand %p594_p5, %p591_p3 }
  0x1d   : > { %599 = shalt.err (!%p596_p7)
}
  0x1e   : > { %s600_s10 = scalar_lea.vmem %s851_s26, 384  ;;  %p608_p1 = scmp.lt.s32.totalorder %s851_s26, %s851_s26 }
  0x1f   : > { %p601_p9 = scmp.ne.s32.totalorder %s851_s26, %s600_s10  ;;  %p609_p12 = scmp.lt.s32.totalorder %s600_s10, %s600_s10 }
  0x21   : > { %p603_p10 = pnand %p601_p9, %p589_p13  ;;  %p610_p0 = por %p609_p12, %p608_p1 }
  0x23   : > { %p604_p6 = pneg %p603_p10 }
  0x25   : > { %p611_p4 = pnand %p610_p0, %p604_p6 }
  0x27   : > { %614 = shalt.err (!%p611_p4)
}
  0x28   : > { %s763_s11 = smov 64   ;;  %s764_s18 = smov 4  }
  0x29   : > { %507 = dma.hbm_to_vmem [thread:$0]  (!%p858_p11), %s1056_s1, 384, %s851_s26, [#allocation6], %s763_s11, %s763_s11, %s764_s18  }
  0x2a   : > { %s615_s4 = scalar_lea.hbm %s1057_s2, 256 }
  0x2b   : > { %p616_p1 = scmp.ne.s32.totalorder %s1057_s2, %s615_s4  ;;  %p622_p10 = scmp.lt.u32.totalorder %s615_s4, %s1057_s2 }
  0x2d   : > { %p618_p4 = pnand %p616_p1, %p589_p13 }
  0x2f   : > { %p619_p6 = pneg %p618_p4 }
  0x31   : > { %p624_p3 = pnand %p622_p10, %p619_p6 }
  0x33   : > { %627 = shalt.err (!%p624_p3)
}
  0x34   : > { %s628_s26 = scalar_lea.vmem %s862_s29, 256  ;;  %p636_p12 = scmp.lt.s32.totalorder %s862_s29, %s862_s29 }
  0x35   : > { %p629_p5 = scmp.ne.s32.totalorder %s862_s29, %s628_s26  ;;  %p637_p0 = scmp.lt.s32.totalorder %s628_s26, %s628_s26 }
  0x37   : > { %p631_p7 = pnand %p629_p5, %p589_p13  ;;  %p638_p1 = por %p637_p0, %p636_p12 }
  0x39   : > { %p632_p9 = pneg %p631_p7 }
  0x3b   : > { %p639_p4 = pnand %p638_p1, %p632_p9 }
  0x3d   : > { %642 = shalt.err (!%p639_p4)
}
  0x3e   : > { %s765_s9 = smov 128   ;;  %s766_s10 = smov 8  }
  0x3f   : > { %510 = dma.hbm_to_vmem [thread:$0]  (!%p858_p11), %s1057_s2, 256, %s862_s29, [#allocation6], %s765_s9, %s765_s9, %s766_s10  }
  0x40   : > { %s32_s28 = sadd.s32 1, %s755_s16  ;;  %s41_s30 = sadd.s32 1, %s747_s14 }
  0x41   : > { %p34_p13 = scmp.ge.s32.totalorder %s32_s28, 2  ;;  %p48_p6 = scmp.ne.s32.totalorder %s747_s14, %s743_s13 }
  0x42   : > { %p49_p10 = scmp.eq.s32.totalorder %s759_s17, 0  ;;  %p521_p3 = scmp.lt.s32.totalorder %s759_s17, 2 }
  0x43   : > { %s1082_s28 = smov (%p34_p13, %s32_s28), 0  ;;  %p929_p7 = por %p831_p2, %p48_p6 }
  0x44   : > { %p50_p5 = por %p49_p10, %p48_p6  ;;  %s36_s27 = ssub.s32 %s755_s16, %s1082_s28 }
  0x45   : > { %s1069_s4 = scalar_select %p929_p7, 1, 0 }
  0x46   : > { %s182_s5 = sand.u32 1, %s747_s14   ;;  %p39_p9 = scmp.eq.s32.totalorder %s36_s27, 0 }
  0x47   : > { %s458_s29 = sshll.u32 %s182_s5, 3  ;;  %s476_s6 = sshll.u32 %s755_s16, 7 }
  0x48   : > { %s938_s7 = scalar_select %p39_p9, %s747_s14, %s41_s30  }
  0x49   : > { %s943_s9 = scalar_lea.hbm %s1055_s0, %s476_s6  ;;  %s186_s21 = scalar_lea.vmem [#allocation2], %s458_s29 }
  0x4a   : > { %s195_s10 = sshll.u32 %s186_s21, 4  ;;  %p947_p2 = pnand %p521_p3, %p50_p5  ;;  %s951_s10 = int_to_ptr.vmem [resolvable:$true] %s195_s10 }
  0x4b   : > { %s953_s25 = scalar_lea.sflag [#allocation3], %s182_s5  ;;  %s643_s30 = scalar_lea.hbm %s943_s9, 128 }
  0x4c   : > { %p644_p11 = scmp.ne.s32.totalorder %s943_s9, %s643_s30  ;;  %p645_p12 = pneg %p947_p2 }
  0x4d   : > { %s648_s6 = scalar_lea.hbm %s1055_s0, 256  ;;  %p649_p4 = scmp.lt.u32.totalorder %s943_s9, %s1055_s0 }
  0x4e   : > { %p646_p0 = pnand %p645_p12, %p644_p11  ;;  %p650_p13 = scmp.lt.u32.totalorder %s648_s6, %s643_s30 }
  0x4f   : > { %p652_p10 = scmp.lt.u32.totalorder %s643_s30, %s943_s9 }
  0x50   : > { %p647_p1 = pneg %p646_p0  ;;  %p651_p6 = por %p650_p13, %p649_p4 }
  0x52   : > { %p653_p3 = por %p652_p10, %p651_p6 }
  0x54   : > { %p654_p5 = pnand %p653_p3, %p647_p1 }
  0x56   : > { %657 = shalt.err (!%p654_p5)
}
  0x57   : > { %s658_s5 = scalar_lea.vmem %s951_s10, 128  ;;  %s767_s21 = smov [#allocation2]  }
  0x58   : > { %p659_p9 = scmp.ne.s32.totalorder %s951_s10, %s658_s5  ;;  %s663_s27 = sshll.u32 %s767_s21, 4  ;;  %s664_s27 = int_to_ptr.vmem [resolvable:$false] %s663_s27 }
  0x59   : > { %s665_s29 = scalar_lea.vmem %s664_s27, 256  ;;  %p666_p7 = scmp.lt.s32.totalorder %s951_s10, %s664_s27 }
  0x5a   : > { %p661_p11 = pnand %p659_p9, %p645_p12  ;;  %p667_p4 = scmp.lt.s32.totalorder %s665_s29, %s658_s5 }
  0x5c   : > { %p662_p0 = pneg %p661_p11  ;;  %p668_p13 = por %p667_p4, %p666_p7 }
  0x5e   : > { %p669_p6 = pnand %p668_p13, %p662_p0 }
  0x60   : > { %672 = shalt.err (!%p669_p6)
}
  0x61   : > { %514 = dma.hbm_to_vmem [thread:$0]  (!%p947_p2), %s943_s9, 128, %s951_s10, %s953_s25, %s763_s11, %s763_s11, %s764_s18  }
  0x62   : > { %207 = sbr.rel (%p847_p8) target bundleno = 353 (0x161), region = 32  ;;  %s987_s30 = sand.u32 (!%p847_p8), 1, %s743_s13  }
  0x63   : > { %s462_s6 = sshll.u32 (!%p847_p8), %s987_s30, 3  ;;  %s210_s8 = scalar_lea.sflag (!%p847_p8), [#allocation3], %s987_s30 }
  0x64   : > { %s213_s26 = scalar_lea.vmem (!%p847_p8), [#allocation2], %s462_s6  ;;  %p1071_p7 = scmp.ne.s32.totalorder (!%p847_p8), %s1065_s22, 0 }
  0x69   : > { %726 = dma.done.wait (%p1071_p7), %s210_s8, 128  }
  0x6a   : > { %728 = vsyncadd (%p1071_p7), %s210_s8, 4294967168  ;;  %p1072_p12 = scmp.ne.s32.totalorder %s1063_s20, 0 }
  0x6c   : > { %730 = dma.done.wait (%p1072_p12), [#allocation6], 640  }
  0x6d   : > { %732 = vsyncadd (%p1072_p12), [#allocation6], 4294966656  ;;  %v768_v0 = vmov 0.0   ;;  %vm769_vm0 = vmmov 0   ;;  %v583_v1 = vld [vmem:[#allocation5] sm:$0xff]   ;;  %v584_v2 = vld [vmem:[#allocation5 + $0x8] sm:$0xff]  }
  0x6e   : > { %482 = vmatprep.subr.bf16.mxu0 %v768_v0  ;;  %488 = vmatprep.mubr.msk.bf16.mxu0 %vm769_vm0, %v768_v0  ;;  %v585_v3 = vld [vmem:[#allocation5 + $0x10] sm:$0xff]   ;;  %vm281_vm1 = vcmask 392192   ;;  %s465_s22 = sshll.u32 %s987_s30, 4  ;;  %v256_v5 = vld [vmem:[#allocation7] sm:$0xff]  ;;  %s477_s11 = sshll.u32 %s751_s15, 8  ;;  %v257_v7 = vld [vmem:[#allocation7 + $0x8] sm:$0xff] }
  0x6f   : > { %483 = vmatpush3.bf16.msra.mxu0 %v583_v1  ;;  %v586_v4 = vld [vmem:[%s213_s26] sm:$0xff]   ;;  %s243_s20 = scalar_lea.vmem [#allocation8], %s465_s22  ;;  %s1006_s10 = scalar_lea.hbm %s1058_s3, %s477_s11 }
  0x70   : > { %484 = vmatprep.subr.bf16.mxu0 %v768_v0  ;;  %s344_s24 = sshll.u32 %s243_s20, 4  ;;  %s329_s15 = scalar_lea.sflag [#allocation4], %s987_s30  ;;  %s1001_s24 = int_to_ptr.vmem [resolvable:$true] %s344_s24 }
  0x71   : > { %s673_s19 = scalar_lea.vmem %s1001_s24, 256  ;;  %p1073_p2 = scmp.ne.s32.totalorder %s1069_s4, 0 }
  0x72   : > { %p674_p8 = scmp.ne.s32.totalorder %s1001_s24, %s673_s19  ;;  %s770_s25 = smov [#allocation8]  }
  0x73   : > { %485 = vmatpush3.bf16.msra.mxu0 %v584_v2  ;;  %s677_s5 = sshll.u32 %s770_s25, 4  ;;  %s678_s5 = int_to_ptr.vmem [resolvable:$false] %s677_s5 }
  0x74   : > { %486 = vmatprep.subr.bf16.mxu0 %v768_v0  ;;  %p675_p1 = pnand %p674_p8, %p1073_p2  ;;  %s679_s21 = scalar_lea.vmem %s678_s5, 512 }
  0x75   : > { %p680_p3 = scmp.lt.s32.totalorder %s1001_s24, %s678_s5  ;;  %p681_p5 = scmp.lt.s32.totalorder %s679_s21, %s673_s19 }
  0x76   : > { %p676_p10 = pneg %p675_p1 }
  0x77   : > { %487 = vmatpush3.bf16.msra.mxu0 %v585_v3  ;;  %p682_p9 = por %p681_p5, %p680_p3 }
  0x79   : > { %p683_p11 = pnand %p682_p9, %p676_p10 }
  0x7a   : > { %489 = vmatmul.mubr.msk.bf16.vlgmr.msra.gmra.mrb[0].mxu0 %vm281_vm1, %v586_v4 }
 0x14d   : > { %v319_v6 = vpop.f32.mrb[0].mxu0 }
 0x14e   : > { %v320_v8 = vadd.f32 %v319_v6, %v256_v5  ;;  %v490_v9 = vpop.f32.mrb[1].mxu0 }
 0x14f   : > { %v322_v10 = vpop.f32.mrb[2].mxu0 }
 0x150   : > { %326 = vst [vmem:[%s243_s20] sm:$0xff] %v320_v8  ;;  %v323_v11 = vadd.f32 %v322_v10, %v257_v7  ;;  %v491_v12 = vpop.f32.mrb[3].mxu0 }
 0x152   : > { %327 = vst [vmem:[%s243_s20 + $0x8] sm:$0xff] %v323_v11 }
 0x153   : > { %686 = shalt.err (!%p683_p11)
}
 0x154   : > { %s687_s27 = scalar_lea.hbm %s1006_s10, 256  ;;  %s691_s8 = scalar_lea.hbm %s1058_s3, 512 }
 0x155   : > { %p688_p0 = scmp.ne.s32.totalorder %s1006_s10, %s687_s27  ;;  %p692_p6 = scmp.lt.u32.totalorder %s1006_s10, %s1058_s3 }
 0x156   : > { %p693_p7 = scmp.lt.u32.totalorder %s691_s8, %s687_s27  ;;  %p695_p8 = scmp.lt.u32.totalorder %s687_s27, %s1006_s10 }
 0x157   : > { %p689_p4 = pnand %p688_p0, %p1073_p2 }
 0x158   : > { %p694_p12 = por %p693_p7, %p692_p6 }
 0x159   : > { %p690_p13 = pneg %p689_p4 }
 0x15a   : > { %p696_p1 = por %p695_p8, %p694_p12 }
 0x15c   : > { %p697_p10 = pnand %p696_p1, %p690_p13 }
 0x15e   : > { %700 = shalt.err (!%p697_p10)
}
 0x15f   : > { %s771_s20 = smov 128   ;;  %s772_s11 = smov 8  }
 0x160   : > { %502 = dma.vmem_to_hbm [thread:$0]  (%p1073_p2), %s1001_s24, 256, %s1006_s10, %s329_s15, %s771_s20, %s771_s20, %s772_s11  }
 0x161 PF: > { %s359_s18 = sand.u32 1, %s739_s12   ;;  %p1074_p3 = scmp.ne.s32.totalorder %s1066_s23, 0 }
 0x162   : > { %p1075_p5 = scmp.ge.s32.totalorder %s759_s17, 2  ;;  %s360_s9 = scalar_lea.sflag [#allocation4], %s359_s18 }
 0x164   : > { %p516_p9 = pnand %p1075_p5, %p1074_p3 }
 0x166   : > { %734 = dma.done.wait (!%p516_p9), %s360_s9, 256  }
 0x167   : > { %736 = vsyncadd (!%p516_p9), %s360_s9, 4294967040  ;;  %s20_s17 = sadd.s32 1, %s759_s17   ;;  %s1076_s12 = smov %s743_s13 }
 0x168   : > { %p17_p11 = scmp.ge.s32.totalorder %s20_s17, 4   ;;  %s1077_s13 = smov %s747_s14 }
 0x169   : > { %s1078_s14 = smov %s938_s7  ;;  %s1079_s15 = smov %s755_s16 }
 0x16a   : > { %s1080_s16 = smov %s1082_s28  ;;  %19 = sbr.rel (!%p17_p11) target bundleno = 7 (0x7), region = 86 }
 0x171   :  { %365 = vsyncpa [#allocation3], 1 }
 0x172   :  { %367 = vsyncpa [#allocation3 + $0x1], 1 }
 0x173   :  { %368 = vsyncpa [#allocation6], 1 }
 0x174   :  { %369 = vsyncpa [#allocation4], 1 }
 0x175   :  { %371 = vsyncpa [#allocation4 + $0x1], 1 }

</bundles_post_ra>
